<compile_context>
chip_gen: v5e
topology: v5e:2x2
jax: 0.10.0
libtpu: 0.0.40
codegen_flags: <defaults>
</compile_context>

<pallas_src>
import functools
import math

import jax
import jax.numpy as jnp
from jax.experimental import pallas as pl
from jax.experimental.pallas import tpu as pltpu


# Above the 16 MiB (v5e) / 32 MiB (v6e, v7x) scoped defaults, below v7x's
# 64 MiB physical VMEM.
_VMEM_LIMIT_BYTES = 48 * 1024 * 1024


def _cparams():
    return pltpu.CompilerParams(
        dimension_semantics=("parallel", "parallel"),
        vmem_limit_bytes=_VMEM_LIMIT_BYTES,
    )


# ----------------------------------------------------------------------------
# Kernels
# ----------------------------------------------------------------------------
def _mha_ln_kernel(q_in_ref, kv_in_ref,
                   wq_ref, bq_ref, wk_ref, bk_ref, wv_ref, bv_ref,
                   wo_ref, bo_ref, gamma_ref, beta_ref,
                   out_ref, *, nheads, d_k, eps):
    """Fused multi-head attention + residual-add + LayerNorm for one
    (batch, query-tile) grid point.  out = LN(q_in + MHA(q_in, kv_in))."""
    x_q = q_in_ref[0]       # (tq, D) f32 -- also the residual
    x_kv = kv_in_ref[0]     # (Tk, D) f32

    xq_bf = x_q.astype(jnp.bfloat16)
    xkv_bf = x_kv.astype(jnp.bfloat16)

    # QKV projections: bf16 operands, f32 accumulation on the MXU.
    q = jnp.dot(xq_bf, wq_ref[...], preferred_element_type=jnp.float32) + bq_ref[...]
    k = jnp.dot(xkv_bf, wk_ref[...], preferred_element_type=jnp.float32) + bk_ref[...]
    v = jnp.dot(xkv_bf, wv_ref[...], preferred_element_type=jnp.float32) + bv_ref[...]

    # Scale applied once to the full (tq, D) q, not per head.
    q = q * (1.0 / math.sqrt(d_k))

    # (T, D) -> (H, T, d_k) once per tensor, then ONE head-batched contraction
    # (no per-head matmul loop, no kh.T transposes, no per-head softmax).
    def split_heads(t):
        return jnp.stack(
            [t[:, h * d_k:(h + 1) * d_k] for h in range(nheads)], axis=0
        ).astype(jnp.bfloat16)

    qh = split_heads(q)     # (H, tq, d_k)
    kh = split_heads(k)     # (H, Tk, d_k)
    vh = split_heads(v)     # (H, Tk, d_k)

    scores = jnp.einsum("hqd,hkd->hqk", qh, kh,
                        preferred_element_type=jnp.float32)      # (H, tq, Tk) f32
    m = jnp.max(scores, axis=-1, keepdims=True)
    p = jnp.exp(scores - m)
    denom = jnp.sum(p, axis=-1, keepdims=True)
    p = p * pl.reciprocal(denom, approx=True)                    # EUP, not VALU divide

    o = jnp.einsum("hqk,hkd->hqd", p.astype(jnp.bfloat16), vh,
                   preferred_element_type=jnp.float32)           # (H, tq, d_k) f32
    o = jnp.concatenate([o[h] for h in range(nheads)], axis=-1)  # (tq, D)

    attn_out = jnp.dot(o.astype(jnp.bfloat16), wo_ref[...],
                       preferred_element_type=jnp.float32) + bo_ref[...]

    # Fused residual-add + LayerNorm epilogue (f32 statistics).
    y = x_q + attn_out
    mean = jnp.mean(y, axis=-1, keepdims=True)
    c = y - mean
    var = jnp.mean(c * c, axis=-1, keepdims=True)
    out_ref[0] = c * jax.lax.rsqrt(var + eps) * gamma_ref[...] + beta_ref[...]


def _ffn_ln_kernel(x_ref, w1_ref, b1_ref, w2_ref, b2_ref,
                   gamma_ref, beta_ref, out_ref, *, eps):
    """out = LN(x + ReLU(x @ W1 + b1) @ W2 + b2) for one (batch, seq-tile)."""
    x = x_ref[0]                                                 # (tt, D) f32
    h = jnp.dot(x.astype(jnp.bfloat16), w1_ref[...],
                preferred_element_type=jnp.float32) + b1_ref[...]
    h = jnp.maximum(h, 0.0)
    y = jnp.dot(h.astype(jnp.bfloat16), w2_ref[...],
                preferred_element_type=jnp.float32) + b2_ref[...]
    y = x + y
    mean = jnp.mean(y, axis=-1, keepdims=True)
    c = y - mean
    var = jnp.mean(c * c, axis=-1, keepdims=True)
    out_ref[0] = c * jax.lax.rsqrt(var + eps) * gamma_ref[...] + beta_ref[...]


# ----------------------------------------------------------------------------
# Wrappers (pallas_call plumbing)
# ----------------------------------------------------------------------------
def _full_spec(shape):
    # whole-array block, identical for every grid step (weights / biases / LN)
    return pl.BlockSpec(shape, lambda b, t: tuple(0 for _ in shape))


def _choose_tile(total, max_tile):
    """Largest tile <= max_tile that divides `total` (multiple of 8 if possible)."""
    if total <= max_tile:
        return total
    for t in range(max_tile, 0, -1):
        if total % t == 0 and (t % 8 == 0 or t == total):
            return t
    return total


def mha_add_ln(q_in, kv_in, attn_p, ln_p, nheads, *, max_q_tile=256, eps=1e-5):
    B, Tq, D = q_in.shape
    _, Tk, _ = kv_in.shape
    d_k = D // nheads
    tq = _choose_tile(Tq, max_q_tile)
    nq = Tq // tq

    kernel = functools.partial(_mha_ln_kernel, nheads=nheads, d_k=d_k, eps=eps)
    return pl.pallas_call(
        kernel,
        out_shape=jax.ShapeDtypeStruct((B, Tq, D), jnp.float32),
        grid=(B, nq),
        in_specs=[
            pl.BlockSpec((1, tq, D), lambda b, t: (b, t, 0)),   # query / residual tile
            pl.BlockSpec((1, Tk, D), lambda b, t: (b, 0, 0)),   # full K/V sequence
            _full_spec((D, D)), _full_spec((1, D)),             # Wq, bq
            _full_spec((D, D)), _full_spec((1, D)),             # Wk, bk
            _full_spec((D, D)), _full_spec((1, D)),             # Wv, bv
            _full_spec((D, D)), _full_spec((1, D)),             # Wo, bo
            _full_spec((1, D)), _full_spec((1, D)),             # LN gamma, beta
        ],
        out_specs=pl.BlockSpec((1, tq, D), lambda b, t: (b, t, 0)),
        compiler_params=_cparams(),
    )(q_in, kv_in,
      attn_p["wq"], attn_p["bq"], attn_p["wk"], attn_p["bk"],
      attn_p["wv"], attn_p["bv"], attn_p["wo"], attn_p["bo"],
      ln_p["gamma"], ln_p["beta"])


def ffn_add_ln(x, ffn_p, ln_p, *, max_t_tile=256, eps=1e-5):
    B, T, D = x.shape
    Dff = ffn_p["w1"].shape[1]
    tt = _choose_tile(T, max_t_tile)
    nt = T // tt

    kernel = functools.partial(_ffn_ln_kernel, eps=eps)
    return pl.pallas_call(
        kernel,
        out_shape=jax.ShapeDtypeStruct((B, T, D), jnp.float32),
        grid=(B, nt),
        in_specs=[
            pl.BlockSpec((1, tt, D), lambda b, t: (b, t, 0)),   # x / residual tile
            _full_spec((D, Dff)), _full_spec((1, Dff)),         # W1, b1
            _full_spec((Dff, D)), _full_spec((1, D)),           # W2, b2
            _full_spec((1, D)), _full_spec((1, D)),             # LN gamma, beta
        ],
        out_specs=pl.BlockSpec((1, tt, D), lambda b, t: (b, t, 0)),
        compiler_params=_cparams(),
    )(x, ffn_p["w1"], ffn_p["b1"], ffn_p["w2"], ffn_p["b2"],
      ln_p["gamma"], ln_p["beta"])
    # TODO(synk): for d_model >= ~1024 on v7x (64 MiB VMEM), add a Dff
    #             reduction grid axis instead of keeping full W1/W2 resident.


def decoder_layer_forward(params, x, memory, nheads):
    """Mirrors TransformerDecoderLayer.forward with masks=None, eval mode.
    Returns only x (attn weights are None in the non-requires_attention path)."""
    x = mha_add_ln(x, x, params["self_attn"], params["ln0"], nheads)       # self-attn + LN0
    x = mha_add_ln(x, memory, params["cross_attn"], params["ln1"], nheads) # cross-attn + LN1
    x = ffn_add_ln(x, params["ffn"], params["ln2"])                        # FFN + LN2
    return x


# ----------------------------------------------------------------------------
# Parameter init (matching module shapes) + bf16 weight prep
# ----------------------------------------------------------------------------
def _xavier_uniform(key, shape, gain=1.0):
    fan_in, fan_out = shape
    a = gain * math.sqrt(6.0 / (fan_in + fan_out))
    return jax.random.uniform(key, shape, jnp.float32, -a, a)


def init_params(key, d_model, nheads):
    dff = d_model * 4
    keys = jax.random.split(key, 16)
    gain = 1.0 / math.sqrt(2.0)

    def attn_params(ks):
        return {
            "wq": _xavier_uniform(ks[0], (d_model, d_model), gain),
            "bq": jnp.zeros((1, d_model), jnp.float32),
            "wk": _xavier_uniform(ks[1], (d_model, d_model), gain),
            "bk": jnp.zeros((1, d_model), jnp.float32),
            "wv": _xavier_uniform(ks[2], (d_model, d_model), gain),
            "bv": jnp.zeros((1, d_model), jnp.float32),
            "wo": _xavier_uniform(ks[3], (d_model, d_model), gain),
            "bo": jnp.zeros((1, d_model), jnp.float32),
        }

    ln = lambda: {"gamma": jnp.ones((1, d_model), jnp.float32),
                  "beta": jnp.zeros((1, d_model), jnp.float32)}

    return {
        "self_attn": attn_params(keys[0:4]),
        "cross_attn": attn_params(keys[4:8]),
        "ffn": {
            "w1": _xavier_uniform(keys[8], (d_model, dff), 1.0),
            "b1": jnp.zeros((1, dff), jnp.float32),
            "w2": _xavier_uniform(keys[9], (dff, d_model), 1.0),
            "b2": jnp.zeros((1, d_model), jnp.float32),
        },
        "ln0": ln(), "ln1": ln(), "ln2": ln(),
    }


def prep_params(params):
    """Cast matmul weights to bf16 (half the DMA bytes / VMEM residency, ~2x
    MXU throughput); biases and LayerNorm params stay f32."""
    def conv(tree):
        out = {}
        for k, v in tree.items():
            if isinstance(v, dict):
                out[k] = conv(v)
            elif k.startswith("w"):
                out[k] = v.astype(jnp.bfloat16)
            else:
                out[k] = v
        return out
    return conv(params)


# ----------------------------------------------------------------------------
# Pure-JAX reference (same bf16 matmul-operand precision) for correctness
# ----------------------------------------------------------------------------
def _ref_linear(x, w, b, dt):
    return jnp.dot(x.astype(dt), w.astype(dt),
                   preferred_element_type=jnp.float32) + b


def _ref_mha(q_in, kv_in, p, nheads, dt):
    B, Tq, D = q_in.shape
    d_k = D // nheads
    q = _ref_linear(q_in, p["wq"], p["bq"], dt) * (1.0 / math.sqrt(d_k))
    k = _ref_linear(kv_in, p["wk"], p["bk"], dt)
    v = _ref_linear(kv_in, p["wv"], p["bv"], dt)

    def split(t):
        return t.reshape(B, -1, nheads, d_k).transpose(0, 2, 1, 3)

    qh, kh, vh = split(q), split(k), split(v)
    scores = jnp.einsum("bhqd,bhkd->bhqk", qh.astype(dt), kh.astype(dt),
                        preferred_element_type=jnp.float32)
    pattn = jax.nn.softmax(scores, axis=-1)
    o = jnp.einsum("bhqk,bhkd->bhqd", pattn.astype(dt), vh.astype(dt),
                   preferred_element_type=jnp.float32)
    o = o.transpose(0, 2, 1, 3).reshape(B, Tq, D)
    return _ref_linear(o, p["wo"], p["bo"], dt)


def _ref_add_ln(x, x2, p, eps=1e-5):
    y = x + x2
    mean = y.mean(-1, keepdims=True)
    var = ((y - mean) ** 2).mean(-1, keepdims=True)
    return (y - mean) / jnp.sqrt(var + eps) * p["gamma"] + p["beta"]


def _ref_forward(params, x, memory, nheads, dt=jnp.bfloat16):
    x2 = _ref_mha(x, x, params["self_attn"], nheads, dt)
    x = _ref_add_ln(x, x2, params["ln0"])
    x2 = _ref_mha(x, memory, params["cross_attn"], nheads, dt)
    x = _ref_add_ln(x, x2, params["ln1"])
    h = jnp.maximum(_ref_linear(x, params["ffn"]["w1"], params["ffn"]["b1"], dt), 0.0)
    x2 = _ref_linear(h, params["ffn"]["w2"], params["ffn"]["b2"], dt)
    x = _ref_add_ln(x, x2, params["ln2"])
    return x


# ----------------------------------------------------------------------------
if __name__ == "__main__":
    # Lane-dense small test: d_model multiple of 128, seq multiple of 8.
    B, T_TGT, T_MEM, D_MODEL, NHEAD = 2, 16, 16, 128, 4

    key = jax.random.PRNGKey(0)
    k_params, k_x, k_mem = jax.random.split(key, 3)

    params_f32 = init_params(k_params, D_MODEL, NHEAD)
    params_krn = prep_params(params_f32)              # bf16 matmul weights
    x = jax.random.normal(k_x, (B, T_TGT, D_MODEL), jnp.float32)
    memory = jax.random.normal(k_mem, (B, T_MEM, D_MODEL), jnp.float32)

    out = decoder_layer_forward(params_krn, x, memory, NHEAD)
    out = jax.block_until_ready(out)

    ref = _ref_forward(params_f32, x, memory, NHEAD)  # same bf16 operand precision
    assert out.shape == (B, T_TGT, D_MODEL)
    assert out.dtype == jnp.float32
    # Remaining diff: approx-reciprocal softmax + accumulation order only.
    assert jnp.allclose(out, ref, atol=3e-2, rtol=3e-2), "mismatch vs reference"

    print("KERNEL_OK")
</pallas_src>

<mosaic_0001>
module attributes {stable_mosaic.version = 11 : i64} {
  func.func @_mha_ln_kernel(%arg0: i32, %arg1: i32, %arg2: memref<1x16x128xf32, #tpu.memory_space<vmem>>, %arg3: memref<1x16x128xf32, #tpu.memory_space<vmem>>, %arg4: memref<128x128xbf16, #tpu.memory_space<vmem>>, %arg5: memref<1x128xf32, #tpu.memory_space<vmem>>, %arg6: memref<128x128xbf16, #tpu.memory_space<vmem>>, %arg7: memref<1x128xf32, #tpu.memory_space<vmem>>, %arg8: memref<128x128xbf16, #tpu.memory_space<vmem>>, %arg9: memref<1x128xf32, #tpu.memory_space<vmem>>, %arg10: memref<128x128xbf16, #tpu.memory_space<vmem>>, %arg11: memref<1x128xf32, #tpu.memory_space<vmem>>, %arg12: memref<1x128xf32, #tpu.memory_space<vmem>>, %arg13: memref<1x128xf32, #tpu.memory_space<vmem>>, %arg14: memref<1x16x128xf32, #tpu.memory_space<vmem>>) attributes {dimension_semantics = [#tpu.dimension_semantics<parallel>, #tpu.dimension_semantics<parallel>], iteration_bounds = array<i64: 2, 1>, scalar_prefetch = 0 : i64, scratch_operands = 0 : i64, tpu.core_type = #tpu.core_type<tc>, window_params = [{transform_indices = @transform_0, window_bounds = array<i64: 1, 16, 128>}, {transform_indices = @transform_1, window_bounds = array<i64: 1, 16, 128>}, {pipeline_mode = #tpu.pipeline_mode<synchronous>, transform_indices = @transform_2, window_bounds = array<i64: 128, 128>}, {pipeline_mode = #tpu.pipeline_mode<synchronous>, transform_indices = @transform_3, window_bounds = array<i64: 1, 128>}, {pipeline_mode = #tpu.pipeline_mode<synchronous>, transform_indices = @transform_4, window_bounds = array<i64: 128, 128>}, {pipeline_mode = #tpu.pipeline_mode<synchronous>, transform_indices = @transform_5, window_bounds = array<i64: 1, 128>}, {pipeline_mode = #tpu.pipeline_mode<synchronous>, transform_indices = @transform_6, window_bounds = array<i64: 128, 128>}, {pipeline_mode = #tpu.pipeline_mode<synchronous>, transform_indices = @transform_7, window_bounds = array<i64: 1, 128>}, {pipeline_mode = #tpu.pipeline_mode<synchronous>, transform_indices = @transform_8, window_bounds = array<i64: 128, 128>}, {pipeline_mode = #tpu.pipeline_mode<synchronous>, transform_indices = @transform_9, window_bounds = array<i64: 1, 128>}, {pipeline_mode = #tpu.pipeline_mode<synchronous>, transform_indices = @transform_10, window_bounds = array<i64: 1, 128>}, {pipeline_mode = #tpu.pipeline_mode<synchronous>, transform_indices = @transform_11, window_bounds = array<i64: 1, 128>}, {transform_indices = @transform_12, window_bounds = array<i64: 1, 16, 128>}]} {
    %c0 = arith.constant 0 : index
    %c0_0 = arith.constant 0 : index
    %c0_1 = arith.constant 0 : index
    %0 = vector.load %arg2[%c0, %c0_0, %c0_1] : memref<1x16x128xf32, #tpu.memory_space<vmem>>, vector<1x16x128xf32>
    %1 = vector.shape_cast %0 : vector<1x16x128xf32> to vector<16x128xf32>
    %c0_2 = arith.constant 0 : index
    %c0_3 = arith.constant 0 : index
    %c0_4 = arith.constant 0 : index
    %2 = vector.load %arg3[%c0_2, %c0_3, %c0_4] : memref<1x16x128xf32, #tpu.memory_space<vmem>>, vector<1x16x128xf32>
    %3 = vector.shape_cast %2 : vector<1x16x128xf32> to vector<16x128xf32>
    %4 = arith.truncf %1 : vector<16x128xf32> to vector<16x128xbf16>
    %5 = arith.truncf %3 : vector<16x128xf32> to vector<16x128xbf16>
    %c0_5 = arith.constant 0 : index
    %c0_6 = arith.constant 0 : index
    %6 = vector.load %arg4[%c0_5, %c0_6] : memref<128x128xbf16, #tpu.memory_space<vmem>>, vector<128x128xbf16>
    %cst = arith.constant dense<0.000000e+00> : vector<16x128xf32>
    %7 = tpu.matmul %4, %6, %cst {dimension_numbers = #tpu.dot_dimension_numbers<[1], [0], [0], [1], [0, 0, 1, 1], [], []>} : vector<16x128xbf16>, vector<128x128xbf16>, vector<16x128xf32> -> vector<16x128xf32>
    %c0_7 = arith.constant 0 : index
    %c0_8 = arith.constant 0 : index
    %8 = vector.load %arg5[%c0_7, %c0_8] : memref<1x128xf32, #tpu.memory_space<vmem>>, vector<1x128xf32>
    %9 = vector.broadcast %8 : vector<1x128xf32> to vector<16x128xf32>
    %10 = arith.addf %7, %9 : vector<16x128xf32>
    %c0_9 = arith.constant 0 : index
    %c0_10 = arith.constant 0 : index
    %11 = vector.load %arg6[%c0_9, %c0_10] : memref<128x128xbf16, #tpu.memory_space<vmem>>, vector<128x128xbf16>
    %cst_11 = arith.constant dense<0.000000e+00> : vector<16x128xf32>
    %12 = tpu.matmul %5, %11, %cst_11 {dimension_numbers = #tpu.dot_dimension_numbers<[1], [0], [0], [1], [0, 0, 1, 1], [], []>} : vector<16x128xbf16>, vector<128x128xbf16>, vector<16x128xf32> -> vector<16x128xf32>
    %c0_12 = arith.constant 0 : index
    %c0_13 = arith.constant 0 : index
    %13 = vector.load %arg7[%c0_12, %c0_13] : memref<1x128xf32, #tpu.memory_space<vmem>>, vector<1x128xf32>
    %14 = vector.broadcast %13 : vector<1x128xf32> to vector<16x128xf32>
    %15 = arith.addf %12, %14 : vector<16x128xf32>
    %c0_14 = arith.constant 0 : index
    %c0_15 = arith.constant 0 : index
    %16 = vector.load %arg8[%c0_14, %c0_15] : memref<128x128xbf16, #tpu.memory_space<vmem>>, vector<128x128xbf16>
    %cst_16 = arith.constant dense<0.000000e+00> : vector<16x128xf32>
    %17 = tpu.matmul %5, %16, %cst_16 {dimension_numbers = #tpu.dot_dimension_numbers<[1], [0], [0], [1], [0, 0, 1, 1], [], []>} : vector<16x128xbf16>, vector<128x128xbf16>, vector<16x128xf32> -> vector<16x128xf32>
    %c0_17 = arith.constant 0 : index
    %c0_18 = arith.constant 0 : index
    %18 = vector.load %arg9[%c0_17, %c0_18] : memref<1x128xf32, #tpu.memory_space<vmem>>, vector<1x128xf32>
    %19 = vector.broadcast %18 : vector<1x128xf32> to vector<16x128xf32>
    %20 = arith.addf %17, %19 : vector<16x128xf32>
    %cst_19 = arith.constant 0.176776692 : f32
    %21 = vector.broadcast %cst_19 : f32 to vector<16x128xf32>
    %22 = arith.mulf %10, %21 : vector<16x128xf32>
    %23 = vector.extract_strided_slice %22 {offsets = [0, 0], sizes = [16, 32], strides = [1, 1]} : vector<16x128xf32> to vector<16x32xf32>
    %24 = vector.extract_strided_slice %22 {offsets = [0, 32], sizes = [16, 32], strides = [1, 1]} : vector<16x128xf32> to vector<16x32xf32>
    %25 = vector.extract_strided_slice %22 {offsets = [0, 64], sizes = [16, 32], strides = [1, 1]} : vector<16x128xf32> to vector<16x32xf32>
    %26 = vector.extract_strided_slice %22 {offsets = [0, 96], sizes = [16, 32], strides = [1, 1]} : vector<16x128xf32> to vector<16x32xf32>
    %27 = vector.shape_cast %23 : vector<16x32xf32> to vector<1x16x32xf32>
    %28 = vector.shape_cast %24 : vector<16x32xf32> to vector<1x16x32xf32>
    %29 = vector.shape_cast %25 : vector<16x32xf32> to vector<1x16x32xf32>
    %30 = vector.shape_cast %26 : vector<16x32xf32> to vector<1x16x32xf32>
    %31 = tpu.concatenate %27, %28, %29, %30 in 0 : vector<1x16x32xf32>, vector<1x16x32xf32>, vector<1x16x32xf32>, vector<1x16x32xf32> -> vector<4x16x32xf32>
    %32 = arith.truncf %31 : vector<4x16x32xf32> to vector<4x16x32xbf16>
    %33 = vector.extract_strided_slice %15 {offsets = [0, 0], sizes = [16, 32], strides = [1, 1]} : vector<16x128xf32> to vector<16x32xf32>
    %34 = vector.extract_strided_slice %15 {offsets = [0, 32], sizes = [16, 32], strides = [1, 1]} : vector<16x128xf32> to vector<16x32xf32>
    %35 = vector.extract_strided_slice %15 {offsets = [0, 64], sizes = [16, 32], strides = [1, 1]} : vector<16x128xf32> to vector<16x32xf32>
    %36 = vector.extract_strided_slice %15 {offsets = [0, 96], sizes = [16, 32], strides = [1, 1]} : vector<16x128xf32> to vector<16x32xf32>
    %37 = vector.shape_cast %33 : vector<16x32xf32> to vector<1x16x32xf32>
    %38 = vector.shape_cast %34 : vector<16x32xf32> to vector<1x16x32xf32>
    %39 = vector.shape_cast %35 : vector<16x32xf32> to vector<1x16x32xf32>
    %40 = vector.shape_cast %36 : vector<16x32xf32> to vector<1x16x32xf32>
    %41 = tpu.concatenate %37, %38, %39, %40 in 0 : vector<1x16x32xf32>, vector<1x16x32xf32>, vector<1x16x32xf32>, vector<1x16x32xf32> -> vector<4x16x32xf32>
    %42 = arith.truncf %41 : vector<4x16x32xf32> to vector<4x16x32xbf16>
    %43 = vector.extract_strided_slice %20 {offsets = [0, 0], sizes = [16, 32], strides = [1, 1]} : vector<16x128xf32> to vector<16x32xf32>
    %44 = vector.extract_strided_slice %20 {offsets = [0, 32], sizes = [16, 32], strides = [1, 1]} : vector<16x128xf32> to vector<16x32xf32>
    %45 = vector.extract_strided_slice %20 {offsets = [0, 64], sizes = [16, 32], strides = [1, 1]} : vector<16x128xf32> to vector<16x32xf32>
    %46 = vector.extract_strided_slice %20 {offsets = [0, 96], sizes = [16, 32], strides = [1, 1]} : vector<16x128xf32> to vector<16x32xf32>
    %47 = vector.shape_cast %43 : vector<16x32xf32> to vector<1x16x32xf32>
    %48 = vector.shape_cast %44 : vector<16x32xf32> to vector<1x16x32xf32>
    %49 = vector.shape_cast %45 : vector<16x32xf32> to vector<1x16x32xf32>
    %50 = vector.shape_cast %46 : vector<16x32xf32> to vector<1x16x32xf32>
    %51 = tpu.concatenate %47, %48, %49, %50 in 0 : vector<1x16x32xf32>, vector<1x16x32xf32>, vector<1x16x32xf32>, vector<1x16x32xf32> -> vector<4x16x32xf32>
    %52 = arith.truncf %51 : vector<4x16x32xf32> to vector<4x16x32xbf16>
    "tpu.trace_start"() <{level = 10 : i32, message = "hqd,hkd->hqk"}> : () -> ()
    %cst_20 = arith.constant dense<0.000000e+00> : vector<4x16x16xf32>
    %53 = tpu.matmul %32, %42, %cst_20 {dimension_numbers = #tpu.dot_dimension_numbers<[2], [2], [1], [1], [0, 0, 0, 1, 1, 1], [0], [0]>} : vector<4x16x32xbf16>, vector<4x16x32xbf16>, vector<4x16x16xf32> -> vector<4x16x16xf32>
    "tpu.trace_stop"() : () -> ()
    %cst_21 = arith.constant dense<0xFF800000> : vector<4x16xf32>
    %54 = vector.multi_reduction <maximumf>, %53, %cst_21 [2] : vector<4x16x16xf32> to vector<4x16xf32>
    %55 = vector.shape_cast %54 : vector<4x16xf32> to vector<4x16x1xf32>
    %56 = vector.broadcast %55 : vector<4x16x1xf32> to vector<4x16x16xf32>
    %57 = arith.subf %53, %56 : vector<4x16x16xf32>
    %58 = math.exp %57 : vector<4x16x16xf32>
    %cst_22 = arith.constant dense<0.000000e+00> : vector<4x16xf32>
    %59 = vector.multi_reduction <add>, %58, %cst_22 [2] : vector<4x16x16xf32> to vector<4x16xf32>
    %60 = vector.shape_cast %59 : vector<4x16xf32> to vector<4x16x1xf32>
    %61 = tpu.reciprocal %60 {approx = true} : vector<4x16x1xf32> -> vector<4x16x1xf32>
    %62 = vector.broadcast %61 : vector<4x16x1xf32> to vector<4x16x16xf32>
    %63 = arith.mulf %58, %62 : vector<4x16x16xf32>
    %64 = arith.truncf %63 : vector<4x16x16xf32> to vector<4x16x16xbf16>
    "tpu.trace_start"() <{level = 10 : i32, message = "hqk,hkd->hqd"}> : () -> ()
    %cst_23 = arith.constant dense<0.000000e+00> : vector<4x16x32xf32>
    %65 = tpu.matmul %64, %52, %cst_23 {dimension_numbers = #tpu.dot_dimension_numbers<[2], [1], [1], [2], [0, 0, 0, 1, 1, 2], [0], [0]>} : vector<4x16x16xbf16>, vector<4x16x32xbf16>, vector<4x16x32xf32> -> vector<4x16x32xf32>
    "tpu.trace_stop"() : () -> ()
    %66 = vector.extract_strided_slice %65 {offsets = [0, 0, 0], sizes = [1, 16, 32], strides = [1, 1, 1]} : vector<4x16x32xf32> to vector<1x16x32xf32>
    %67 = vector.shape_cast %66 : vector<1x16x32xf32> to vector<16x32xf32>
    %68 = vector.extract_strided_slice %65 {offsets = [1, 0, 0], sizes = [1, 16, 32], strides = [1, 1, 1]} : vector<4x16x32xf32> to vector<1x16x32xf32>
    %69 = vector.shape_cast %68 : vector<1x16x32xf32> to vector<16x32xf32>
    %70 = vector.extract_strided_slice %65 {offsets = [2, 0, 0], sizes = [1, 16, 32], strides = [1, 1, 1]} : vector<4x16x32xf32> to vector<1x16x32xf32>
    %71 = vector.shape_cast %70 : vector<1x16x32xf32> to vector<16x32xf32>
    %72 = vector.extract_strided_slice %65 {offsets = [3, 0, 0], sizes = [1, 16, 32], strides = [1, 1, 1]} : vector<4x16x32xf32> to vector<1x16x32xf32>
    %73 = vector.shape_cast %72 : vector<1x16x32xf32> to vector<16x32xf32>
    %74 = tpu.concatenate %67, %69, %71, %73 in 1 : vector<16x32xf32>, vector<16x32xf32>, vector<16x32xf32>, vector<16x32xf32> -> vector<16x128xf32>
    %75 = arith.truncf %74 : vector<16x128xf32> to vector<16x128xbf16>
    %c0_24 = arith.constant 0 : index
    %c0_25 = arith.constant 0 : index
    %76 = vector.load %arg10[%c0_24, %c0_25] : memref<128x128xbf16, #tpu.memory_space<vmem>>, vector<128x128xbf16>
    %cst_26 = arith.constant dense<0.000000e+00> : vector<16x128xf32>
    %77 = tpu.matmul %75, %76, %cst_26 {dimension_numbers = #tpu.dot_dimension_numbers<[1], [0], [0], [1], [0, 0, 1, 1], [], []>} : vector<16x128xbf16>, vector<128x128xbf16>, vector<16x128xf32> -> vector<16x128xf32>
    %c0_27 = arith.constant 0 : index
    %c0_28 = arith.constant 0 : index
    %78 = vector.load %arg11[%c0_27, %c0_28] : memref<1x128xf32, #tpu.memory_space<vmem>>, vector<1x128xf32>
    %79 = vector.broadcast %78 : vector<1x128xf32> to vector<16x128xf32>
    %80 = arith.addf %77, %79 : vector<16x128xf32>
    %81 = arith.addf %1, %80 : vector<16x128xf32>
    %cst_29 = arith.constant dense<0.000000e+00> : vector<16xf32>
    %82 = vector.multi_reduction <add>, %81, %cst_29 [1] : vector<16x128xf32> to vector<16xf32>
    %83 = vector.shape_cast %82 : vector<16xf32> to vector<16x1xf32>
    %cst_30 = arith.constant 1.280000e+02 : f32
    %84 = vector.broadcast %cst_30 : f32 to vector<16x1xf32>
    %85 = arith.divf %83, %84 : vector<16x1xf32>
    %86 = vector.broadcast %85 : vector<16x1xf32> to vector<16x128xf32>
    %87 = arith.subf %81, %86 : vector<16x128xf32>
    %88 = arith.mulf %87, %87 : vector<16x128xf32>
    %cst_31 = arith.constant dense<0.000000e+00> : vector<16xf32>
    %89 = vector.multi_reduction <add>, %88, %cst_31 [1] : vector<16x128xf32> to vector<16xf32>
    %90 = vector.shape_cast %89 : vector<16xf32> to vector<16x1xf32>
    %cst_32 = arith.constant 1.280000e+02 : f32
    %91 = vector.broadcast %cst_32 : f32 to vector<16x1xf32>
    %92 = arith.divf %90, %91 : vector<16x1xf32>
    %cst_33 = arith.constant 9.99999974E-6 : f32
    %93 = vector.broadcast %cst_33 : f32 to vector<16x1xf32>
    %94 = arith.addf %92, %93 : vector<16x1xf32>
    %95 = math.rsqrt %94 : vector<16x1xf32>
    %96 = vector.broadcast %95 : vector<16x1xf32> to vector<16x128xf32>
    %97 = arith.mulf %87, %96 : vector<16x128xf32>
    %c0_34 = arith.constant 0 : index
    %c0_35 = arith.constant 0 : index
    %98 = vector.load %arg12[%c0_34, %c0_35] : memref<1x128xf32, #tpu.memory_space<vmem>>, vector<1x128xf32>
    %99 = vector.broadcast %98 : vector<1x128xf32> to vector<16x128xf32>
    %100 = arith.mulf %97, %99 : vector<16x128xf32>
    %c0_36 = arith.constant 0 : index
    %c0_37 = arith.constant 0 : index
    %101 = vector.load %arg13[%c0_36, %c0_37] : memref<1x128xf32, #tpu.memory_space<vmem>>, vector<1x128xf32>
    %102 = vector.broadcast %101 : vector<1x128xf32> to vector<16x128xf32>
    %103 = arith.addf %100, %102 : vector<16x128xf32>
    %c0_38 = arith.constant 0 : index
    %c0_39 = arith.constant 0 : index
    %c0_40 = arith.constant 0 : index
    %104 = vector.load %arg14[%c0_38, %c0_39, %c0_40] : memref<1x16x128xf32, #tpu.memory_space<vmem>>, vector<1x16x128xf32>
    %105 = vector.shape_cast %104 : vector<1x16x128xf32> to vector<16x128xf32>
    %106 = vector.shape_cast %103 : vector<16x128xf32> to vector<1x16x128xf32>
    tpu.vector_store %arg14[%c0_38, %c0_39, %c0_40], %106 {strides = array<i32>} : memref<1x16x128xf32, #tpu.memory_space<vmem>>, vector<1x16x128xf32>,
    return
  }
  func.func @transform_0(%arg0: i32, %arg1: i32) -> (i32, i32, i32) {
    %c0_i32 = arith.constant 0 : i32
    %c0_i32_0 = arith.constant 0 : i32
    return %arg0, %arg1, %c0_i32 : i32, i32, i32
  }
  func.func @transform_1(%arg0: i32, %arg1: i32) -> (i32, i32, i32) {
    %c0_i32 = arith.constant 0 : i32
    %c0_i32_0 = arith.constant 0 : i32
    %c0_i32_1 = arith.constant 0 : i32
    return %arg0, %c0_i32, %c0_i32_0 : i32, i32, i32
  }
  func.func @transform_2(%arg0: i32, %arg1: i32) -> (i32, i32) {
    %c0_i32 = arith.constant 0 : i32
    %c0_i32_0 = arith.constant 0 : i32
    %c0_i32_1 = arith.constant 0 : i32
    return %c0_i32, %c0_i32_0 : i32, i32
  }
  func.func @transform_3(%arg0: i32, %arg1: i32) -> (i32, i32) {
    %c0_i32 = arith.constant 0 : i32
    %c0_i32_0 = arith.constant 0 : i32
    %c0_i32_1 = arith.constant 0 : i32
    return %c0_i32, %c0_i32_0 : i32, i32
  }
  func.func @transform_4(%arg0: i32, %arg1: i32) -> (i32, i32) {
    %c0_i32 = arith.constant 0 : i32
    %c0_i32_0 = arith.constant 0 : i32
    %c0_i32_1 = arith.constant 0 : i32
    return %c0_i32, %c0_i32_0 : i32, i32
  }
  func.func @transform_5(%arg0: i32, %arg1: i32) -> (i32, i32) {
    %c0_i32 = arith.constant 0 : i32
    %c0_i32_0 = arith.constant 0 : i32
    %c0_i32_1 = arith.constant 0 : i32
    return %c0_i32, %c0_i32_0 : i32, i32
  }
  func.func @transform_6(%arg0: i32, %arg1: i32) -> (i32, i32) {
    %c0_i32 = arith.constant 0 : i32
    %c0_i32_0 = arith.constant 0 : i32
    %c0_i32_1 = arith.constant 0 : i32
    return %c0_i32, %c0_i32_0 : i32, i32
  }
  func.func @transform_7(%arg0: i32, %arg1: i32) -> (i32, i32) {
    %c0_i32 = arith.constant 0 : i32
    %c0_i32_0 = arith.constant 0 : i32
    %c0_i32_1 = arith.constant 0 : i32
    return %c0_i32, %c0_i32_0 : i32, i32
  }
  func.func @transform_8(%arg0: i32, %arg1: i32) -> (i32, i32) {
    %c0_i32 = arith.constant 0 : i32
    %c0_i32_0 = arith.constant 0 : i32
    %c0_i32_1 = arith.constant 0 : i32
    return %c0_i32, %c0_i32_0 : i32, i32
  }
  func.func @transform_9(%arg0: i32, %arg1: i32) -> (i32, i32) {
    %c0_i32 = arith.constant 0 : i32
    %c0_i32_0 = arith.constant 0 : i32
    %c0_i32_1 = arith.constant 0 : i32
    return %c0_i32, %c0_i32_0 : i32, i32
  }
  func.func @transform_10(%arg0: i32, %arg1: i32) -> (i32, i32) {
    %c0_i32 = arith.constant 0 : i32
    %c0_i32_0 = arith.constant 0 : i32
    %c0_i32_1 = arith.constant 0 : i32
    return %c0_i32, %c0_i32_0 : i32, i32
  }
  func.func @transform_11(%arg0: i32, %arg1: i32) -> (i32, i32) {
    %c0_i32 = arith.constant 0 : i32
    %c0_i32_0 = arith.constant 0 : i32
    %c0_i32_1 = arith.constant 0 : i32
    return %c0_i32, %c0_i32_0 : i32, i32
  }
  func.func @transform_12(%arg0: i32, %arg1: i32) -> (i32, i32, i32) {
    %c0_i32 = arith.constant 0 : i32
    %c0_i32_0 = arith.constant 0 : i32
    return %arg0, %arg1, %c0_i32 : i32, i32, i32
  }
}

</mosaic_0001>

<bundles_post_ra>
// kernel: tpu_custom_call.1
= control target key start
LH: loop header
LB: loop body
LE: loop exit
PB: predicated region body
PF: predicated region fallthrough
CT: control target
= control target key end

     0   :  { %s2648_s0 = inlined_call_operand.hbm [shape: f32[2,16,128], index: 0, kind: input, shape index: {}]   ;;  %s2649_s1 = inlined_call_operand.hbm [shape: f32[2,16,128], index: 1, kind: input, shape index: {}]   ;;  %s2650_s2 = inlined_call_operand.hbm [shape: bf16[128,128], index: 2, kind: input, shape index: {}]   ;;  %s2651_s3 = inlined_call_operand.vmem [shape: f32[1,128], index: 3, kind: input, shape index: {}]   ;;  %s2652_s4 = inlined_call_operand.hbm [shape: bf16[128,128], index: 4, kind: input, shape index: {}]   ;;  %s2653_s5 = inlined_call_operand.vmem [shape: f32[1,128], index: 5, kind: input, shape index: {}]   ;;  %s2654_s6 = inlined_call_operand.hbm [shape: bf16[128,128], index: 6, kind: input, shape index: {}]   ;;  %s2655_s7 = inlined_call_operand.vmem [shape: f32[1,128], index: 7, kind: input, shape index: {}]   ;;  %s2656_s8 = inlined_call_operand.hbm [shape: bf16[128,128], index: 8, kind: input, shape index: {}]   ;;  %s2657_s9 = inlined_call_operand.vmem [shape: f32[1,128], index: 9, kind: input, shape index: {}]   ;;  %s2658_s10 = inlined_call_operand.vmem [shape: f32[1,128], index: 10, kind: input, shape index: {}]   ;;  %s2659_s11 = inlined_call_operand.vmem [shape: f32[1,128], index: 11, kind: input, shape index: {}]   ;;  %s2660_s12 = inlined_call_operand.hbm [shape: f32[2,16,128], index: 12, kind: output, shape index: {}]  }
   0x1   :  { %2667 = sst [smem:[#allocation26_spill]] %s2650_s2 }
   0x2   :  { %2668 = sst [smem:[#allocation27_spill]] %s2652_s4 }
   0x3   :  { %2669 = sst [smem:[#allocation28_spill]] %s2654_s6 }
   0x4   :  { %2670 = sst [smem:[#allocation29_spill]] %s2656_s8 }
   0x5   :  { %2671 = sst [smem:[#allocation30_spill]] %s2659_s11 }
   0x6   :  { %2672 = sst [smem:[#allocation31_spill]] %s2660_s12 }
   0x7   :  { %17 = vsyncpa [#allocation3], 0 }
   0x8   :  { %19 = vsyncpa [#allocation3 + $0x1], 0 }
   0x9   :  { %20 = vsyncpa [#allocation6], 0 }
   0xa   :  { %22 = vsyncpa [#allocation6 + $0x1], 0 }
   0xb   :  { %23 = vsyncpa [#allocation9], 0 }
   0xc   :  { %24 = vsyncpa [#allocation12], 0 }
   0xd   :  { %25 = vsyncpa [#allocation4], 0 }
   0xe   :  { %27 = vsyncpa [#allocation4 + $0x1], 0  ;;  %s2354_s21 = smov 0   ;;  %s2356_s22 = smov 0  }
   0xf   :  { %s2358_s23 = smov 0   ;;  %s2360_s24 = smov 0  }
  0x10   :  { %s2362_s25 = smov 0   ;;  %s2364_s26 = smov 0  }
  0x11 LB: > { %2673 = sst [smem:[#allocation20_spill]] %s2253_s21  ;;  %s2385_s27 = sadd.s32 4294967295, %s2273_s26   ;;  %s2273_s26 = sphi %s2364_s26, %s33_s26   ;;  %s2269_s25 = sphi %s2362_s25, %s2696_s25   ;;  %s2265_s24 = sphi %s2360_s24, %s2695_s24   ;;  %s2261_s23 = sphi %s2358_s23, %s2694_s23   ;;  %s2257_s22 = sphi %s2356_s22, %s2698_s22   ;;  %s2253_s21 = sphi %s2354_s21, %s2697_s21  }
  0x12   : > { %2674 = sst [smem:[#allocation21_spill]] %s2261_s23  ;;  %s1576_s28 = sadd.s32 4294967294, %s2273_s26  }
  0x13   : > { %2675 = sst [smem:[#allocation22_spill]] %s2269_s25  ;;  %p67_p0 = scmp.ne.s32.totalorder %s2257_s22, %s2253_s21 }
  0x14   : > { %p68_p1 = scmp.eq.s32.totalorder %s2385_s27, 0  ;;  %p329_p2 = scmp.eq.s32.totalorder %s2385_s27, 1 }
  0x15   : > { %p335_p3 = scmp.eq.s32.totalorder %s1576_s28, 1  ;;  %p1577_p5 = scmp.ge.s32.totalorder %s2273_s26, 1 }
  0x16   : > { %p2394_p4 = por %p68_p1, %p67_p0  ;;  %p342_p7 = scmp.lt.s32.totalorder %s2273_s26, 3 }
  0x17   : > { %p2399_p6 = por %p335_p3, %p67_p0  ;;  %s2679_s2 = sld [smem:[#allocation26_spill]] }
  0x18   : > { %p2407_p8 = pnand %p1577_p5, %p342_p7  ;;  %s2275_s17 = smov [#allocation7]  }
  0x19   : > { %s2677_s30 = scalar_select %p2399_p6, 1, 0 }
  0x1a   : > { %p1795_p9 = pneg %p2407_p8  ;;  %s355_s18 = sshll.u32 %s2275_s17, 4  ;;  %s356_s18 = int_to_ptr.vmem [resolvable:$true] %s355_s18 }
  0x1b   : > { %2678 = sst [smem:[#allocation23_spill]] %s2677_s30  ;;  %p1582_p11 = scmp.ge.s32.totalorder %s2273_s26, 2 }
  0x1c   : > { %p2415_p10 = pnand %p1795_p9, %p68_p1  ;;  %s2682_s4 = sld [smem:[#allocation27_spill]] }
  0x1d   : > { %s353_s15 = sshll.u32 %s2679_s2, 4  ;;  %s2276_s14 = smov 64   ;;  %s354_s15 = int_to_ptr.hbm [resolvable:$true] %s353_s15 }
  0x1e   : > { %s2277_s2 = smov 4   ;;  %s2278_s17 = smov [#allocation8]  }
  0x1f   : > { %1798 = dma.hbm_to_vmem [thread:$0]  (!%p2415_p10), %s354_s15, 1024, %s356_s18, [#allocation6], %s2276_s14, %s2276_s14, %s2277_s2  }
  0x20   : > { %s372_s30 = sshll.u32 %s2278_s17, 4  ;;  %s2683_s6 = sld [smem:[#allocation28_spill]]  ;;  %s373_s30 = int_to_ptr.vmem [resolvable:$true] %s372_s30 }
  0x21   : > { %s2684_s8 = sld [smem:[#allocation29_spill]]  ;;  %s2279_s18 = smov [#allocation10]  }
  0x22   : > { %s370_s13 = sshll.u32 %s2682_s4, 4  ;;  %s389_s4 = sshll.u32 %s2279_s18, 4  ;;  %s371_s13 = int_to_ptr.hbm [resolvable:$true] %s370_s13  ;;  %s390_s4 = int_to_ptr.vmem [resolvable:$true] %s389_s4 }
  0x23   : > { %1801 = dma.hbm_to_vmem [thread:$0]  (!%p2415_p10), %s371_s13, 1024, %s373_s30, [#allocation9], %s2276_s14, %s2276_s14, %s2277_s2  }
  0x24   : > { %s2280_s12 = smov [#allocation11]   ;;  %s45_s30 = sadd.s32 1, %s2269_s25 }
  0x25   : > { %s406_s21 = sshll.u32 %s2280_s12, 4  ;;  %s54_s13 = sadd.s32 1, %s2261_s23  ;;  %s407_s21 = int_to_ptr.vmem [resolvable:$true] %s406_s21 }
  0x26   : > { %s387_s11 = sshll.u32 %s2683_s6, 4  ;;  %p47_p12 = scmp.ge.s32.totalorder %s45_s30, 2  ;;  %s388_s11 = int_to_ptr.hbm [resolvable:$true] %s387_s11 }
  0x27   : > { %s404_s15 = sshll.u32 %s2684_s8, 4  ;;  %p61_p13 = scmp.ne.s32.totalorder %s2261_s23, %s2257_s22  ;;  %s405_s15 = int_to_ptr.hbm [resolvable:$true] %s404_s15 }
  0x28   : > { %1804 = dma.hbm_to_vmem [thread:$0]  (!%p2415_p10), %s388_s11, 1024, %s390_s4, [#allocation9], %s2276_s14, %s2276_s14, %s2277_s2  }
  0x29   : > { %1807 = dma.hbm_to_vmem [thread:$0]  (!%p2415_p10), %s405_s15, 1024, %s407_s21, [#allocation12], %s2276_s14, %s2276_s14, %s2277_s2  }
  0x2a   : > { %p62_p0 = scmp.eq.s32.totalorder %s2273_s26, 0  ;;  %p1823_p3 = scmp.lt.s32.totalorder %s2273_s26, 2 }
  0x2b   : > { %s2700_s30 = smov (%p47_p12, %s45_s30), 0  ;;  %p2451_p7 = por %p329_p2, %p61_p13 }
  0x2c   : > { %2685 = sst [smem:[#allocation24_spill]] %s2700_s30  ;;  %p2445_p5 = por %p62_p0, %p61_p13 }
  0x2d   : > { %s49_s2 = ssub.s32 %s2269_s25, %s2700_s30  ;;  %s429_s11 = sand.u32 1, %s2261_s23  }
  0x2e   : > { %p52_p9 = scmp.eq.s32.totalorder %s49_s2, 0  ;;  %s1583_s19 = sshll.u32 %s429_s11, 4 }
  0x2f   : > { %s1738_s14 = sshll.u32 %s2269_s25, 4  ;;  %s433_s21 = scalar_lea.vmem [#allocation2], %s1583_s19 }
  0x30   : > { %s2460_s20 = scalar_select %p52_p9, %s2261_s23, %s54_s13  }
  0x31   : > { %s440_s18 = scalar_lea.hbm %s2648_s0, %s1738_s14  ;;  %s443_s6 = sshll.u32 %s433_s21, 4  ;;  %s444_s6 = int_to_ptr.vmem [resolvable:$true] %s443_s6 }
  0x32   : > { %2688 = sst [smem:[#allocation25_spill]] %s2460_s20  ;;  %s441_s12 = sshll.u32 %s440_s18, 4  ;;  %s442_s12 = int_to_ptr.hbm [resolvable:$true] %s441_s12 }
  0x33   : > { %p1809_p2 = pnand %p1823_p3, %p2445_p5  ;;  %s462_s2 = scalar_lea.hbm %s2649_s1, %s1738_s14 }
  0x34   : > { %s430_s25 = scalar_lea.sflag [#allocation3], %s429_s11  ;;  %s2281_s13 = smov 128  }
  0x35   : > { %s2282_s20 = smov 8   ;;  %s463_s23 = sshll.u32 %s462_s2, 4  ;;  %s464_s23 = int_to_ptr.hbm [resolvable:$true] %s463_s23 }
  0x36   : > { %1811 = dma.hbm_to_vmem [thread:$0]  (!%p1809_p2), %s442_s12, 256, %s444_s6, %s430_s25, %s2281_s13, %s2281_s13, %s2282_s20  }
  0x37   : > { %s457_s28 = scalar_lea.vmem [#allocation5], %s1583_s19  ;;  %s453_s18 = sand.u32 1, %s2273_s26  }
  0x38   : > { %s465_s15 = sshll.u32 %s457_s28, 4  ;;  %s454_s21 = scalar_lea.sflag [#allocation6], %s453_s18  ;;  %s466_s15 = int_to_ptr.vmem [resolvable:$true] %s465_s15 }
  0x39   : > { %1814 = dma.hbm_to_vmem [thread:$0]  (!%p1809_p2), %s464_s23, 256, %s466_s15, %s454_s21, %s2281_s13, %s2281_s13, %s2282_s20  }
  0x3a   : > { %477 = sbr.rel (%p2407_p8) target bundleno = 1479 (0x5c7), region = 68  ;;  %s2476_s17 = sand.u32 (!%p2407_p8), 1, %s2257_s22  }
  0x3b   : > { %s2479_s8 = sshll.u32 (!%p2407_p8), %s2476_s17, 4  ;;  %s480_s6 = scalar_lea.sflag (!%p2407_p8), [#allocation3], %s2476_s17 }
  0x3c   : > { %s483_s25 = scalar_lea.vmem (!%p2407_p8), [#allocation2], %s2479_s8 }
  0x3f   : > { %2228 = dma.done.wait (%p2394_p4), %s480_s6, 256  }
  0x40   : > { %2230 = vsyncadd (%p2394_p4), %s480_s6, 4294967040  ;;  %s489_s23 = sand.u32 1, %s2385_s27   ;;  %s493_s30 = scalar_lea.vmem [#allocation5], %s2479_s8 }
  0x41   : > { %s490_s16 = scalar_lea.sflag [#allocation6], %s489_s23 }
  0x42   : > { %2232 = dma.done.wait (%p2394_p4), %s490_s16, 256  }
  0x43   : > { %2234 = vsyncadd (%p2394_p4), %s490_s16, 4294967040 }
  0x44   : > { %2236 = dma.done.wait (%p68_p1), [#allocation6], 1024  }
  0x45   : > { %2238 = vsyncadd (%p68_p1), [#allocation6], 4294966272 }
  0x46   : > { %2240 = dma.done.wait (%p68_p1), [#allocation9], 2048  }
  0x47   : > { %2242 = vsyncadd (%p68_p1), [#allocation9], 4294965248 }
  0x48   : > { %2244 = dma.done.wait (%p68_p1), [#allocation12], 1024  }
  0x49   : > { %2246 = vsyncadd (%p68_p1), [#allocation12], 4294966272  ;;  %v1747_v0 = vld [vmem:[#allocation7 + $0x38] sm:$0xff]  ;;  %v1746_v2 = vld [vmem:[#allocation7 + $0x30] sm:$0xff]  ;;  %s2283_s14 = smov 32   ;;  %s2284_s20 = smov 64  }
  0x4a   : > { %v1755_v1 = vld [vmem:[#allocation8 + $0x38] sm:$0xff]  ;;  %637 = vmatpush.bf16.msra.mxu0 %v1747_v0  ;;  %v1754_v3 = vld [vmem:[#allocation8 + $0x30] sm:$0xff]  ;;  %v1745_v4 = vld [vmem:[#allocation7 + $0x28] sm:$0xff]  ;;  %s2285_s12 = smov 96   ;;  %vm911_vm0 = vcmask 261120   ;;  %vm1022_vm1 = vcmask 130048  }
  0x4b   : > { %719 = vmatpush.bf16.msra.mxu1 %v1755_v1  ;;  %v1753_v5 = vld [vmem:[#allocation8 + $0x28] sm:$0xff]  ;;  %v1744_v6 = vld [vmem:[#allocation7 + $0x20] sm:$0xff]  ;;  %v1743_v8 = vld [vmem:[#allocation7 + $0x18] sm:$0xff]  ;;  %vm1257_vm2 = vcmask 523264   ;;  %vm1260_vm3 = vcmask 785408   ;;  %s2689_s23 = sld [smem:[#allocation30_spill]] }
  0x4c   : > { %v1752_v7 = vld [vmem:[#allocation8 + $0x20] sm:$0xff]  ;;  %v1751_v9 = vld [vmem:[#allocation8 + $0x18] sm:$0xff]  ;;  %v1742_v10 = vld [vmem:[#allocation7 + $0x10] sm:$0xff]  ;;  %s1772_s16 = sshll.u32 %s2265_s24, 4  ;;  %s2690_s29 = sld [smem:[#allocation31_spill]] }
  0x4d   : > { %v1750_v11 = vld [vmem:[#allocation8 + $0x10] sm:$0xff]  ;;  %v1741_v12 = vld [vmem:[#allocation7 + $0x8] sm:$0xff]  ;;  %v1740_v14 = vld [vmem:[#allocation7] sm:$0xff]  ;;  %s559_s19 = scalar_lea.vmem [#allocation13], %s2479_s8  ;;  %s1410_s24 = scalar_lea.sflag [#allocation4], %s2476_s17 }
  0x4e   : > { %638 = vmatpush.bf16.msra.mxu0 %v1746_v2  ;;  %v1749_v13 = vld [vmem:[#allocation8 + $0x8] sm:$0xff]  ;;  %v1748_v15 = vld [vmem:[#allocation8] sm:$0xff] }
  0x4f   : > { %720 = vmatpush.bf16.msra.mxu1 %v1754_v3  ;;  %v2507_v16 = vld [vmem:[%s483_s25] sm:$0xff]  ;;  %v2511_v17 = vld [vmem:[%s483_s25 + $0x8] sm:$0xff] }
  0x50   : > { %v565_v18 = vld [vmem:[%s493_s30] sm:$0xff]  ;;  %v566_v19 = vld [vmem:[%s493_s30 + $0x8] sm:$0xff]  ;;  %v567_v20 = vpack.c.bf16 %v2511_v17, %v2507_v16 }
  0x51   : > { %v2519_v21 = vpack.c.bf16 %v566_v19, %v565_v18  ;;  %v1952_v24 = vld [vmem:[%s2653_s5] ss:$0 sm:$0xff] }
  0x52   : > { %639 = vmatpush.bf16.msra.mxu0 %v1745_v4  ;;  %v1951_v25 = vld [vmem:[%s2651_s3] ss:$0 sm:$0xff]  ;;  %s1423_s11 = scalar_lea.hbm %s2690_s29, %s1772_s16  ;;  %s2195_s28 = scalar_lea.hbm %s2690_s29, 32 }
  0x53   : > { %721 = vmatpush.bf16.msra.mxu1 %v1753_v5 }
  0x56   : > { %640 = vmatpush.bf16.msra.mxu0 %v1744_v6 }
  0x57   : > { %722 = vmatpush.bf16.msra.mxu1 %v1752_v7 }
  0x5a   : > { %641 = vmatpush.bf16.msra.mxu0 %v1743_v8 }
  0x5b   : > { %723 = vmatpush.bf16.msra.mxu1 %v1751_v9 }
  0x5e   : > { %642 = vmatpush.bf16.msra.mxu0 %v1742_v10 }
  0x5f   : > { %724 = vmatpush.bf16.msra.mxu1 %v1750_v11 }
  0x62   : > { %643 = vmatpush.bf16.msra.mxu0 %v1741_v12 }
  0x63   : > { %725 = vmatpush.bf16.msra.mxu1 %v1749_v13 }
  0x66   : > { %644 = vmatpush.bf16.msra.mxu0 %v1740_v14 }
  0x67   : > { %726 = vmatpush.bf16.msra.mxu1 %v1748_v15 }
  0x69   : > { %645 = vmatmul.bf16.vlgmr.msra.gmra.mxu0 %v567_v20 }
  0x6a   : > { %727 = vmatmul.bf16.vlgmr.msra.gmra.mxu1 %v2519_v21 }
  0xe6   : > { %v646_v22 = vpop.f32.mrf.mxu0 }
  0xe7   : > { %v728_v23 = vpop.f32.mrf.mxu1  ;;  %v647_v31 = vadd.f32 %v1951_v25, %v646_v22 }
  0xe8   : > { %v729_v26 = vadd.f32 %v1952_v24, %v728_v23 }
  0xe9   : > { %v815_v36 = vmul.f32 0.17677669, %v647_v31 }
  0xea   : > { %v865_v32 = vpack.c.bf16 %v729_v26, %v729_v26 }
  0xeb   : > { %v837_v42 = vpack.c.bf16 %v815_v36, %v815_v36 }
  0xec   : > { %v908_v37 = vunpack.c.l.b16 %v865_v32 }
  0xed   : > { %v903_v45 = vunpack.c.l.b16 %v837_v42  ;;  %v1762_v42 = vld [vmem:[#allocation10 + $0x30] sm:$0xff] }
  0xee   : > { %v648_v27 = vpop.f32.mrf.mxu0 }
  0xef   : > { %v730_v28 = vpop.f32.mrf.mxu1  ;;  %v649_v29 = vadd.f32 %v1951_v25, %v648_v27 }
  0xf0   : > { %v731_v30 = vadd.f32 %v1952_v24, %v730_v28 }
  0xf1   : > { %v816_v34 = vmul.f32 0.17677669, %v649_v29 }
  0xf2   : > { %v1911_v33 = vpack.i.bf16 %v731_v30, %v729_v26  ;;  %v866_v35 = vpack.c.bf16 %v731_v30, %v731_v30 }
  0xf3   : > { %v838_v40 = vpack.c.bf16 %v816_v34, %v816_v34  ;;  %v1916_v43 = vpack.i.bf16 %v816_v34, %v815_v36 }
  0xf4   : > { %1912 = vrot.lane.b32.xlu2 %v1911_v33, %s2283_s14  ;;  %1902 = vrot.lane.b32.xlu1 %v1911_v33, %s2284_s20  ;;  %v909_v38 = vunpack.c.l.b16 %v866_v35 }
  0xf5   : > { %1892 = vrot.lane.b32.xlu0 %v1911_v33, %s2285_s12  ;;  %v904_v44 = vunpack.c.l.b16 %v838_v40 }
  0xf6   : > { %v910_v39 = vpack.c.b16 %v909_v38, %v908_v37 }
  0xf7   : > { %v905_v46 = vpack.c.b16 %v904_v44, %v903_v45  ;;  %v1760_v44 = vld [vmem:[#allocation10 + $0x20] sm:$0xff]  ;;  %v1759_v45 = vld [vmem:[#allocation10 + $0x18] sm:$0xff] }
  0xf8   : > { %v916_v41 = vsel %vm911_vm0, %v910_v39, 0 }
  0xf9   : > { %925 = vmatpush.bf16.xpose.msra.mxu3 %v916_v41  ;;  %v1763_v41 = vld [vmem:[#allocation10 + $0x38] sm:$0xff] }
  0xfa   : > { %801 = vmatpush.bf16.msra.mxu2 %v1763_v41 }
  0xfc   : > { %1917 = vrot.lane.b32.xlu2 %v1916_v43, %s2283_s14  ;;  %1907 = vrot.lane.b32.xlu1 %v1916_v43, %s2284_s20 }
  0xfd   : > { %1897 = vrot.lane.b32.xlu0 %v1916_v43, %s2285_s12  ;;  %v1761_v43 = vld [vmem:[#allocation10 + $0x28] sm:$0xff] }
  0xfe   : > { %802 = vmatpush.bf16.msra.mxu2 %v1762_v42 }
 0x100   : > { %1693 = vmatmul.msk.bf16.vlgmr.msra.gmra.mxu3 %vm911_vm0, %v905_v46 }
 0x102   : > { %803 = vmatpush.bf16.msra.mxu2 %v1761_v43 }
 0x106   : > { %804 = vmatpush.bf16.msra.mxu2 %v1760_v44 }
 0x10a   : > { %805 = vmatpush.bf16.msra.mxu2 %v1759_v45 }
 0x14e   : > { %v1913_v47 = vpop.permute.xlu2 %1912 }
 0x14f   : > { %v1915_v48 = vunpack.i.h.bf16 %v1913_v47  ;;  %v1914_v49 = vunpack.i.l.bf16 %v1913_v47  ;;  %v1758_v47 = vld [vmem:[#allocation10 + $0x10] sm:$0xff] }
 0x150   : > { %806 = vmatpush.bf16.msra.mxu2 %v1758_v47 }
 0x151   : > { %v872_v50 = vpack.c.bf16 %v1915_v48, %v1915_v48  ;;  %v871_v51 = vpack.c.bf16 %v1914_v49, %v1914_v49  ;;  %v1757_v48 = vld [vmem:[#allocation10 + $0x8] sm:$0xff] }
 0x153   : > { %v1000_v52 = vunpack.c.l.b16 %v872_v50  ;;  %v999_v53 = vunpack.c.l.b16 %v871_v51  ;;  %v1756_v50 = vld [vmem:[#allocation10] sm:$0xff] }
 0x154   : > { %807 = vmatpush.bf16.msra.mxu2 %v1757_v48 }
 0x155   : > { %v1001_v54 = vpack.c.b16 %v1000_v52, %v999_v53 }
 0x156   : > { %v1918_v55 = vpop.permute.xlu2 %1917 }
 0x157   : > { %v1920_v56 = vunpack.i.h.bf16 %v1918_v55  ;;  %v1919_v57 = vunpack.i.l.bf16 %v1918_v55  ;;  %v1006_v58 = vsel %vm911_vm0, %v1001_v54, 0 }
 0x158   : > { %1015 = vmatpush.bf16.xpose.msrb.mxu0 %v1006_v58  ;;  %808 = vmatpush.bf16.msra.mxu2 %v1756_v50 }
 0x159   : > { %v844_v59 = vpack.c.bf16 %v1920_v56, %v1920_v56  ;;  %v843_v60 = vpack.c.bf16 %v1919_v57, %v1919_v57 }
 0x15b   : > { %v995_v61 = vunpack.c.l.b16 %v844_v59  ;;  %v994_v62 = vunpack.c.l.b16 %v843_v60  ;;  %809 = vmatmul.bf16.vlgmr.msra.gmra.mxu2 %v2519_v21 }
 0x15d   : > { %v996_v63 = vpack.c.b16 %v995_v61, %v994_v62 }
 0x15f   : > { %1696 = vmatmul.msk.bf16.vlgmr.msrb.gmra.mxu0 %vm911_vm0, %v996_v63 }
 0x166   : > { %v1903_v0 = vpop.permute.xlu1 %1902 }
 0x167   : > { %v1905_v1 = vunpack.i.h.bf16 %v1903_v0  ;;  %v1904_v2 = vunpack.i.l.bf16 %v1903_v0  ;;  %v1893_v3 = vpop.permute.xlu0 %1892 }
 0x168   : > { %v1895_v4 = vunpack.i.h.bf16 %v1893_v3  ;;  %v1894_v5 = vunpack.i.l.bf16 %v1893_v3 }
 0x169   : > { %v870_v6 = vpack.c.bf16 %v1905_v1, %v1905_v1  ;;  %v869_v7 = vpack.c.bf16 %v1904_v2, %v1904_v2 }
 0x16a   : > { %v868_v8 = vpack.c.bf16 %v1895_v4, %v1895_v4  ;;  %v867_v9 = vpack.c.bf16 %v1894_v5, %v1894_v5 }
 0x16b   : > { %v970_v10 = vunpack.c.l.b16 %v870_v6  ;;  %v969_v11 = vunpack.c.l.b16 %v869_v7 }
 0x16c   : > { %v940_v12 = vunpack.c.l.b16 %v868_v8  ;;  %v939_v13 = vunpack.c.l.b16 %v867_v9 }
 0x16d   : > { %v971_v14 = vpack.c.b16 %v970_v10, %v969_v11  ;;  %v1953_v10 = vld [vmem:[%s2655_s7] ss:$0 sm:$0xff] }
 0x16e   : > { %v941_v15 = vpack.c.b16 %v940_v12, %v939_v13  ;;  %v1908_v29 = vpop.permute.xlu1 %1907 }
 0x16f   : > { %v1898_v18 = vpop.permute.xlu0 %1897  ;;  %v976_v19 = vsel %vm911_vm0, %v971_v14, 0  ;;  %v1910_v30 = vunpack.i.h.bf16 %v1908_v29  ;;  %v1909_v31 = vunpack.i.l.bf16 %v1908_v29 }
 0x170   : > { %v1900_v20 = vunpack.i.h.bf16 %v1898_v18  ;;  %v1899_v22 = vunpack.i.l.bf16 %v1898_v18  ;;  %v946_v23 = vsel %vm911_vm0, %v941_v15, 0 }
 0x171   : > { %955 = vmatpush.bf16.xpose.msrb.mxu3 %v946_v23  ;;  %v842_v32 = vpack.c.bf16 %v1910_v30, %v1910_v30  ;;  %v841_v33 = vpack.c.bf16 %v1909_v31, %v1909_v31 }
 0x172   : > { %v840_v24 = vpack.c.bf16 %v1900_v20, %v1900_v20  ;;  %v839_v25 = vpack.c.bf16 %v1899_v22, %v1899_v22 }
 0x173   : > { %v965_v34 = vunpack.c.l.b16 %v842_v32  ;;  %v964_v35 = vunpack.c.l.b16 %v841_v33 }
 0x174   : > { %v935_v26 = vunpack.c.l.b16 %v840_v24  ;;  %v934_v27 = vunpack.c.l.b16 %v839_v25 }
 0x175   : > { %v966_v38 = vpack.c.b16 %v965_v34, %v964_v35 }
 0x176   : > { %v936_v28 = vpack.c.b16 %v935_v26, %v934_v27 }
 0x178   : > { %1694 = vmatmul.msk.bf16.vlgmr.msrb.gmra.mxu3 %vm911_vm0, %v936_v28 }
 0x179   : > { %985 = vmatpush.bf16.xpose.msra.mxu3 %v976_v19 }
 0x183   : > { %v927_v36 = vpop.f32.mrf.mxu3 }
 0x184   : > { %v1023_v37 = vsel %vm1022_vm1, %v927_v36, -inf }
 0x185   : > { %1024 = vmax.xlane.f32.xlu0 %v1023_v37 }
 0x188   : > { %1695 = vmatmul.msk.bf16.vlgmr.msra.gmra.mxu3 %vm911_vm0, %v966_v38 }
 0x18b   : > { %v929_v39 = vpop.f32.mrf.mxu3 }
 0x18c   : > { %v1026_v40 = vsel %vm1022_vm1, %v929_v39, -inf }
 0x18d   : > { %1027 = vmax.xlane.f32.xlu1 %v1026_v40 }
 0x1dc   : > { %v2544_v46 = vpop.f32.mrf.mxu0 }
 0x1dd   : > { %v1041_v62 = vsel %vm1022_vm1, %v2544_v46, -inf }
 0x1de   : > { %v810_v6 = vpop.f32.mrf.mxu2 }
 0x1df   : > { %v811_v12 = vadd.f32 %v1953_v10, %v810_v6 }
 0x1e1   : > { %v893_v18 = vpack.c.bf16 %v811_v12, %v811_v12 }
 0x1e3   : > { %v1126_v22 = vunpack.c.l.b16 %v893_v18 }
 0x1e4   : > { %v2546_v49 = vpop.f32.mrf.mxu0 }
 0x1e5   : > { %v1044_v51 = vsel %vm1022_vm1, %v2546_v49, -inf }
 0x1e6   : > { %1045 = vmax.xlane.f32.xlu0 %v1044_v51  ;;  %v812_v11 = vpop.f32.mrf.mxu2 }
 0x1e7   : > { %v813_v13 = vadd.f32 %v1953_v10, %v812_v11 }
 0x1e9   : > { %v894_v19 = vpack.c.bf16 %v813_v13, %v813_v13 }
 0x1eb   : > { %v1127_v23 = vunpack.c.l.b16 %v894_v19 }
 0x1ed   : > { %v1128_v27 = vpack.c.b16 %v1127_v23, %v1126_v22 }
 0x1ef   : > { %1140 = vmatpush.bf16.msrb.mxu2 %v1128_v27 }
 0x1f8   : > { %v1025_v59 = vpop.xlane.xlu0 %1024 }
 0x1f9   : > { %v1047_v60 = vsub.f32 %v927_v36, %v1025_v59  ;;  %v1921_v59 = vpack.i.bf16 %v813_v13, %v811_v12 }
 0x1fb   : > { %v957_v52 = vpop.f32.mrf.mxu3  ;;  %v1055_v63 = vmul.f32 1.442695, %v1047_v60 }
 0x1fc   : > { %v1029_v53 = vsel %vm1022_vm1, %v957_v52, -inf }
 0x1fd   : > { %1030 = vmax.xlane.f32.xlu2 %v1029_v53 }
 0x200   : > { %v1028_v54 = vpop.xlane.xlu1 %1027 }
 0x201   : > { %v1048_v55 = vsub.f32 %v929_v39, %v1028_v54 }
 0x203   : > { %v959_v56 = vpop.f32.mrf.mxu3  ;;  %v1057_v58 = vmul.f32 1.442695, %v1048_v55 }
 0x204   : > { %v1032_v57 = vsel %vm1022_vm1, %v959_v56, -inf }
 0x205   : > { %1033 = vmax.xlane.f32.xlu2 %v1032_v57  ;;  %1957 = vpow2.f32 %v1057_v58 }
 0x206   : > { %1959 = vpow2.f32 %v1055_v63 }
 0x20b   : > { %v987_v61 = vpop.f32.mrf.mxu3  ;;  %v2556_v0 = vpop.eup %1957 }
 0x20c   : > { %v1035_v21 = vsel %vm1022_vm1, %v987_v61, -inf  ;;  %v1074_v2 = vsel %vm1022_vm1, %v2556_v0, 0.0  ;;  %v1960_v4 = vpop.eup %1959 }
 0x20d   : > { %1042 = vmax.xlane.f32.xlu2 %v1041_v62  ;;  %1036 = vmax.xlane.f32.xlu0 %v1035_v21  ;;  %v1071_v5 = vsel %vm1022_vm1, %v1960_v4, 0.0 }
 0x213   : > { %v989_v1 = vpop.f32.mrf.mxu3 }
 0x214   : > { %v1038_v3 = vsel %vm1022_vm1, %v989_v1, -inf }
 0x215   : > { %1075 = vadd.xlane.f32.xlu2 %v1074_v2  ;;  %1039 = vmax.xlane.f32.xlu1 %v1038_v3 }
 0x21d   : > { %1072 = vadd.xlane.f32.xlu1 %v1071_v5 }
 0x259   : > { %v1046_v14 = vpop.xlane.xlu0 %1045 }
 0x25a   : > { %v1054_v32 = vsub.f32 %v2546_v49, %v1046_v14 }
 0x25c   : > { %v1069_v37 = vmul.f32 1.442695, %v1054_v32 }
 0x270   : > { %v1031_v7 = vpop.xlane.xlu2 %1030 }
 0x271   : > { %v1049_v8 = vsub.f32 %v957_v52, %v1031_v7 }
 0x273   : > { %v1059_v9 = vmul.f32 1.442695, %v1049_v8 }
 0x275   : > { %1961 = vpow2.f32 %v1059_v9 }
 0x278   : > { %v1034_v15 = vpop.xlane.xlu2 %1033 }
 0x279   : > { %v1050_v20 = vsub.f32 %v959_v56, %v1034_v15 }
 0x27b   : > { %v2565_v24 = vpop.eup %1961  ;;  %v1061_v25 = vmul.f32 1.442695, %v1050_v20 }
 0x27c   : > { %v1077_v26 = vsel %vm1022_vm1, %v2565_v24, 0.0 }
 0x27d   : > { %1963 = vpow2.f32 %v1061_v25  ;;  %1078 = vadd.xlane.f32.xlu0 %v1077_v26 }
 0x280   : > { %v1043_v28 = vpop.xlane.xlu2 %1042  ;;  %v1037_v29 = vpop.xlane.xlu0 %1036 }
 0x281   : > { %v1053_v30 = vsub.f32 %v2544_v46, %v1043_v28  ;;  %v1051_v31 = vsub.f32 %v987_v61, %v1037_v29 }
 0x283   : > { %v1964_v33 = vpop.eup %1963  ;;  %v1067_v34 = vmul.f32 1.442695, %v1053_v30  ;;  %v1063_v35 = vmul.f32 1.442695, %v1051_v31 }
 0x284   : > { %v1080_v36 = vsel %vm1022_vm1, %v1964_v33, 0.0 }
 0x285   : > { %1965 = vpow2.f32 %v1067_v34  ;;  %1081 = vadd.xlane.f32.xlu1 %v1080_v36 }
 0x286   : > { %1967 = vpow2.f32 %v1063_v35 }
 0x287   : > { %1969 = vpow2.f32 %v1069_v37 }
 0x288   : > { %v1076_v38 = vpop.xlane.xlu2 %1075  ;;  %v1040_v39 = vpop.xlane.xlu1 %1039 }
 0x289   : > { %1971 = vrcp.f32 %v1076_v38  ;;  %v1052_v41 = vsub.f32 %v989_v1, %v1040_v39 }
 0x28b   : > { %v2572_v40 = vpop.eup %1965  ;;  %v1065_v45 = vmul.f32 1.442695, %v1052_v41 }
 0x28c   : > { %v1968_v42 = vpop.eup %1967  ;;  %v1089_v43 = vsel %vm1022_vm1, %v2572_v40, 0.0 }
 0x28d   : > { %1090 = vadd.xlane.f32.xlu0 %v1089_v43  ;;  %v1083_v44 = vsel %vm1022_vm1, %v1968_v42, 0.0  ;;  %v2577_v46 = vpop.eup %1969 }
 0x28e   : > { %1084 = vadd.xlane.f32.xlu2 %v1083_v44  ;;  %v1092_v50 = vsel %vm1022_vm1, %v2577_v46, 0.0 }
 0x28f   : > { %v1972_v48 = vpop.eup %1971 }
 0x290   : > { %v1073_v47 = vpop.xlane.xlu1 %1072  ;;  %v1104_v49 = vmul.f32 %v1972_v48, %v2556_v0 }
 0x291   : > { %1973 = vrcp.f32 %v1073_v47 }
 0x292   : > { %1975 = vpow2.f32 %v1065_v45  ;;  %v1112_v52 = vpack.c.bf16 %v1104_v49, %v1104_v49 }
 0x294   : > { %v1122_v56 = vunpack.c.l.b16 %v1112_v52 }
 0x295   : > { %1093 = vadd.xlane.f32.xlu0 %v1092_v50 }
 0x297   : > { %v1974_v51 = vpop.eup %1973 }
 0x298   : > { %v1103_v53 = vmul.f32 %v1974_v51, %v1960_v4  ;;  %v1976_v54 = vpop.eup %1975 }
 0x299   : > { %v1086_v58 = vsel %vm1022_vm1, %v1976_v54, 0.0 }
 0x29a   : > { %v1111_v55 = vpack.c.bf16 %v1103_v53, %v1103_v53 }
 0x29c   : > { %v1121_v57 = vunpack.c.l.b16 %v1111_v55 }
 0x29d   : > { %1087 = vadd.xlane.f32.xlu0 %v1086_v58 }
 0x29e   : > { %1922 = vrot.lane.b32.xlu1 %v1921_v59, %s2285_s12  ;;  %v1123_v60 = vpack.c.b16 %v1122_v56, %v1121_v57 }
 0x2a0   : > { %1697 = vmatmul.msk.bf16.vlgmr.msrb.gmra.mxu2 %vm1022_vm1, %v1123_v60 }
 0x2a6   : > { %1927 = vrot.lane.b32.xlu2 %v1921_v59, %s2284_s20 }
 0x2b1   : > { %1932 = vrot.lane.b32.xlu0 %v1921_v59, %s2283_s14 }
 0x2f0   : > { %v1079_v61 = vpop.xlane.xlu0 %1078 }
 0x2f8   : > { %v1082_v63 = vpop.xlane.xlu1 %1081 }
 0x2f9   : > { %1977 = vrcp.f32 %v1082_v63 }
 0x2fa   : > { %1979 = vrcp.f32 %v1079_v61 }
 0x2ff   : > { %v1978_v4 = vpop.eup %1977 }
 0x300   : > { %v1091_v62 = vpop.xlane.xlu0 %1090  ;;  %v1980_v7 = vpop.eup %1979  ;;  %v1106_v8 = vmul.f32 %v1978_v4, %v1964_v33  ;;  %v1769_v4 = vld [vmem:[#allocation11 + $0x28] sm:$0xff] }
 0x301   : > { %v1085_v21 = vpop.xlane.xlu2 %1084  ;;  %v1105_v11 = vmul.f32 %v1980_v7, %v2565_v24  ;;  %v1766_v7 = vld [vmem:[#allocation11 + $0x10] sm:$0xff] }
 0x302   : > { %1981 = vrcp.f32 %v1085_v21  ;;  %v1114_v20 = vpack.c.bf16 %v1106_v8, %v1106_v8  ;;  %v1765_v8 = vld [vmem:[#allocation11 + $0x8] sm:$0xff] }
 0x303   : > { %v1113_v25 = vpack.c.bf16 %v1105_v11, %v1105_v11 }
 0x304   : > { %v1150_v29 = vunpack.c.l.b16 %v1114_v20 }
 0x305   : > { %v1149_v32 = vunpack.c.l.b16 %v1113_v25 }
 0x307   : > { %v1151_v34 = vpack.c.b16 %v1150_v29, %v1149_v32 }
 0x308   : > { %v1094_v0 = vpop.xlane.xlu0 %1093  ;;  %v1982_v15 = vpop.eup %1981 }
 0x309   : > { %v1928_v1 = vpop.permute.xlu2 %1927  ;;  %v1107_v26 = vmul.f32 %v1982_v15, %v1968_v42 }
 0x30a   : > { %v1930_v2 = vunpack.i.h.bf16 %v1928_v1  ;;  %v1929_v3 = vunpack.i.l.bf16 %v1928_v1 }
 0x30b   : > { %v1115_v24 = vpack.c.bf16 %v1107_v26, %v1107_v26 }
 0x30c   : > { %v898_v5 = vpack.c.bf16 %v1930_v2, %v1930_v2  ;;  %v897_v6 = vpack.c.bf16 %v1929_v3, %v1929_v3  ;;  %v1771_v2 = vld [vmem:[#allocation11 + $0x38] sm:$0xff]  ;;  %v1770_v3 = vld [vmem:[#allocation11 + $0x30] sm:$0xff] }
 0x30d   : > { %v1177_v36 = vunpack.c.l.b16 %v1115_v24  ;;  %1332 = vmatpush.bf16.msrb.mxu1 %v1771_v2 }
 0x30e   : > { %v1183_v9 = vunpack.c.l.b16 %v898_v5  ;;  %v1182_v10 = vunpack.c.l.b16 %v897_v6  ;;  %v1768_v5 = vld [vmem:[#allocation11 + $0x20] sm:$0xff]  ;;  %v1767_v6 = vld [vmem:[#allocation11 + $0x18] sm:$0xff] }
 0x310   : > { %v1184_v12 = vpack.c.b16 %v1183_v9, %v1182_v10  ;;  %v1088_v13 = vpop.xlane.xlu0 %1087  ;;  %v1923_v14 = vpop.permute.xlu1 %1922  ;;  %v1764_v9 = vld [vmem:[#allocation11] sm:$0xff] }
 0x311   : > { %1983 = vrcp.f32 %v1088_v13  ;;  %v1925_v18 = vunpack.i.h.bf16 %v1923_v14  ;;  %v1924_v19 = vunpack.i.l.bf16 %v1923_v14  ;;  %1333 = vmatpush.bf16.msrb.mxu1 %v1770_v3 }
 0x312   : > { %1196 = vmatpush.bf16.msrb.mxu3 %v1184_v12  ;;  %1985 = vrcp.f32 %v1094_v0 }
 0x313   : > { %v896_v22 = vpack.c.bf16 %v1925_v18, %v1925_v18  ;;  %v895_v23 = vpack.c.bf16 %v1924_v19, %v1924_v19  ;;  %1987 = vrcp.f32 %v1091_v62 }
 0x315   : > { %v1155_v27 = vunpack.c.l.b16 %v896_v22  ;;  %v1154_v28 = vunpack.c.l.b16 %v895_v23  ;;  %1334 = vmatpush.bf16.msrb.mxu1 %v1769_v4 }
 0x317   : > { %v1984_v30 = vpop.eup %1983  ;;  %v1156_v31 = vpack.c.b16 %v1155_v27, %v1154_v28 }
 0x318   : > { %v1108_v33 = vmul.f32 %v1984_v30, %v1976_v54  ;;  %v1986_v38 = vpop.eup %1985  ;;  %v1954_v30 = vld [vmem:[%s2657_s9] ss:$0 sm:$0xff] }
 0x319   : > { %1168 = vmatpush.bf16.msra.mxu2 %v1156_v31  ;;  %v1988_v41 = vpop.eup %1987  ;;  %v1110_v42 = vmul.f32 %v1986_v38, %v2577_v46  ;;  %1335 = vmatpush.bf16.msrb.mxu1 %v1768_v5 }
 0x31a   : > { %v1116_v35 = vpack.c.bf16 %v1108_v33, %v1108_v33  ;;  %v1109_v43 = vmul.f32 %v1988_v41, %v2572_v40 }
 0x31b   : > { %v1118_v48 = vpack.c.bf16 %v1110_v42, %v1110_v42 }
 0x31c   : > { %v1178_v37 = vunpack.c.l.b16 %v1116_v35  ;;  %1698 = vmatmul.msk.bf16.vlgmr.msra.gmra.mxu2 %vm1022_vm1, %v1151_v34  ;;  %v1117_v51 = vpack.c.bf16 %v1109_v43, %v1109_v43 }
 0x31d   : > { %v1206_v54 = vunpack.c.l.b16 %v1118_v48  ;;  %1336 = vmatpush.bf16.msrb.mxu1 %v1767_v6 }
 0x31e   : > { %v1179_v39 = vpack.c.b16 %v1178_v37, %v1177_v36  ;;  %v1205_v56 = vunpack.c.l.b16 %v1117_v51  ;;  %v2286_v36 = vmov 128.0  }
 0x31f   : > { %1989 = vrcp.f32 %v2286_v36 }
 0x320   : > { %1699 = vmatmul.msk.bf16.vlgmr.msrb.gmra.mxu3 %vm1022_vm1, %v1179_v39  ;;  %v1207_v57 = vpack.c.b16 %v1206_v54, %v1205_v56 }
 0x321   : > { %1337 = vmatpush.bf16.msrb.mxu1 %v1766_v7 }
 0x323   : > { %v1933_v44 = vpop.permute.xlu0 %1932  ;;  %v1142_v58 = vpop.f32.mrf.mxu2 }
 0x324   : > { %v1935_v45 = vunpack.i.h.bf16 %v1933_v44  ;;  %v1934_v47 = vunpack.i.l.bf16 %v1933_v44 }
 0x325   : > { %1338 = vmatpush.bf16.msrb.mxu1 %v1765_v8  ;;  %v1990_v37 = vpop.eup %1989 }
 0x326   : > { %v900_v49 = vpack.c.bf16 %v1935_v45, %v1935_v45  ;;  %v899_v50 = vpack.c.bf16 %v1934_v47, %v1934_v47  ;;  %v1353_v38 = vmul.f32 128.0, %v1990_v37  ;;  %vm1357_vm4 = vweird.f32 %v1990_v37 }
 0x328   : > { %v1211_v52 = vunpack.c.l.b16 %v900_v49  ;;  %v1210_v53 = vunpack.c.l.b16 %v899_v50  ;;  %v1354_v39 = vsub.f32 1.0, %v1353_v38 }
 0x329   : > { %1339 = vmatpush.bf16.msrb.mxu1 %v1764_v9 }
 0x32a   : > { %v1212_v55 = vpack.c.b16 %v1211_v52, %v1210_v53  ;;  %v1355_v41 = vmul.f32 %v1990_v37, %v1354_v39 }
 0x32b   : > { %v1144_v46 = vpop.f32.mrf.mxu2 }
 0x32c   : > { %1224 = vmatpush.bf16.msra.mxu0 %v1212_v55  ;;  %v1356_v42 = vadd.f32 %v1990_v37, %v1355_v41 }
 0x32e   : > { %v1358_v43 = vsel %vm1357_vm4, %v1990_v37, %v1356_v42 }
 0x32f   : > { %1700 = vmatmul.msk.bf16.vlgmr.msra.gmra.mxu0 %vm1022_vm1, %v1207_v57 }
 0x39f   : > { %v1170_v59 = vpop.f32.mrf.mxu2 }
 0x3a3   : > { %v1198_v40 = vpop.f32.mrf.mxu3 }
 0x3a7   : > { %v1172_v60 = vpop.f32.mrf.mxu2 }
 0x3a8   : > { %v1936_v61 = vpack.i.bf16 %v1172_v60, %v1170_v59 }
 0x3aa   : > { %1937 = vrot.lane.b32.xlu1 %v1936_v61, %s2283_s14  ;;  %s1424_s14 = sshll.u32 %s559_s19, 4  ;;  %s1425_s14 = int_to_ptr.vmem [resolvable:$true] %s1424_s14 }
 0x3ab   : > { %v1200_v62 = vpop.f32.mrf.mxu3 }
 0x3ac   : > { %v1941_v21 = vpack.i.bf16 %v1200_v62, %v1198_v40  ;;  %v1226_v63 = vpop.f32.mrf.mxu0 }
 0x3ae   : > { %1942 = vrot.lane.b32.xlu2 %v1941_v21, %s2284_s20  ;;  %v1955_v21 = vld [vmem:[%s2658_s10] ss:$0 sm:$0xff]  ;;  %s1426_s20 = sshll.u32 %s1423_s11, 4  ;;  %s1427_s20 = int_to_ptr.hbm [resolvable:$true] %s1426_s20 }
 0x3b4   : > { %v1228_v0 = vpop.f32.mrf.mxu0 }
 0x3b5   : > { %v1946_v1 = vpack.i.bf16 %v1228_v0, %v1226_v63 }
 0x3b7   : > { %1947 = vrot.lane.b32.xlu1 %v1946_v1, %s2285_s12  ;;  %v1956_v1 = vld [vmem:[%s2689_s23] ss:$0 sm:$0xff]  ;;  %s2189_s12 = sshra.s32 %s1427_s20, 4  ;;  %s2190_s12 = int_to_ptr.hbm [resolvable:$true] %s2189_s12 }
 0x3b8   : > { %s2191_s2 = scalar_lea.hbm %s2190_s12, 16  ;;  %p2196_p10 = scmp.lt.s32.totalorder %s2190_s12, %s2690_s29 }
 0x3b9   : > { %p2192_p1 = scmp.ne.s32.totalorder %s2190_s12, %s2191_s2  ;;  %p2197_p12 = scmp.lt.s32.totalorder %s2195_s28, %s2191_s2 }
 0x3bb   : > { %p2193_p4 = pnand %p2192_p1, %p2451_p7  ;;  %p2198_p13 = por %p2197_p12, %p2196_p10 }
 0x3bd   : > { %p2194_p8 = pneg %p2193_p4 }
 0x3bf   : > { %p2199_p0 = pnand %p2198_p13, %p2194_p8 }
 0x408   : > { %v1943_v13 = vpop.permute.xlu2 %1942 }
 0x409   : > { %v1945_v18 = vunpack.i.h.bf16 %v1943_v13  ;;  %v1944_v19 = vunpack.i.l.bf16 %v1943_v13 }
 0x41c   : > { %v1938_v10 = vpop.permute.xlu1 %1937 }
 0x41d   : > { %v1940_v11 = vunpack.i.h.bf16 %v1938_v10  ;;  %v1939_v12 = vunpack.i.l.bf16 %v1938_v10 }
 0x41f   : > { %v1256_v14 = vsel %vm911_vm0, %v1144_v46, %v1940_v11  ;;  %v1255_v15 = vsel %vm911_vm0, %v1142_v58, %v1939_v12 }
 0x420   : > { %v1258_v25 = vsel %vm1257_vm2, %v1255_v15, %v1944_v19  ;;  %v1259_v26 = vsel %vm1257_vm2, %v1256_v14, %v1945_v18 }
 0x429   : > { %v1948_v20 = vpop.permute.xlu1 %1947 }
 0x42a   : > { %v1950_v22 = vunpack.i.h.bf16 %v1948_v20  ;;  %v1949_v23 = vunpack.i.l.bf16 %v1948_v20 }
 0x42c   : > { %v1261_v27 = vsel %vm1260_vm3, %v1258_v25, %v1949_v23  ;;  %v1262_v28 = vsel %vm1260_vm3, %v1259_v26, %v1950_v22 }
 0x42d   : > { %v1263_v29 = vpack.c.bf16 %v1262_v28, %v1261_v27 }
 0x42f   : > { %1340 = vmatmul.bf16.vlgmr.msrb.gmra.mxu1 %v1263_v29 }
 0x4ac   : > { %v1341_v31 = vpop.f32.mrf.mxu1 }
 0x4ad   : > { %v1342_v32 = vadd.f32 %v1954_v30, %v1341_v31 }
 0x4af   : > { %v1346_v24 = vadd.f32 %v1342_v32, %v2507_v16 }
 0x4b1   : > { %1348 = vadd.xlane.f32.xlu2 %v1346_v24 }
 0x4b4   : > { %v1343_v33 = vpop.f32.mrf.mxu1 }
 0x4b5   : > { %v1344_v34 = vadd.f32 %v1954_v30, %v1343_v33 }
 0x4b7   : > { %v1347_v35 = vadd.f32 %v1344_v34, %v2511_v17 }
 0x4b9   : > { %1350 = vadd.xlane.f32.xlu1 %v1347_v35 }
 0x524   : > { %v1349_v44 = vpop.xlane.xlu2 %1348 }
 0x525   : > { %v1359_v45 = vmul.f32 %v1358_v43, %v1349_v44 }
 0x527   : > { %v1361_v47 = vsub.f32 %v1346_v24, %v1359_v45 }
 0x529   : > { %v1363_v48 = vmul.f32 %v1361_v47, %v1361_v47 }
 0x52b   : > { %1365 = vadd.xlane.f32.xlu0 %v1363_v48 }
 0x52c   : > { %v1351_v16 = vpop.xlane.xlu1 %1350 }
 0x52d   : > { %v1360_v49 = vmul.f32 %v1358_v43, %v1351_v16 }
 0x52f   : > { %v1362_v50 = vsub.f32 %v1347_v35, %v1360_v49 }
 0x531   : > { %v1364_v51 = vmul.f32 %v1362_v50, %v1362_v50 }
 0x533   : > { %1367 = vadd.xlane.f32.xlu2 %v1364_v51 }
 0x59e   : > { %v1366_v17 = vpop.xlane.xlu0 %1365 }
 0x59f   : > { %v1369_v52 = vmul.f32 %v1366_v17, %v1358_v43 }
 0x5a1   : > { %v1371_v53 = vadd.f32 1e-05, %v1369_v52 }
 0x5a3   : > { %1991 = vrsqrt.f32 %v1371_v53  ;;  %vm1379_vm6 = vweird.f32 %v1371_v53 }
 0x5a6   : > { %v1368_v54 = vpop.xlane.xlu2 %1367 }
 0x5a7   : > { %v1370_v55 = vmul.f32 %v1368_v54, %v1358_v43 }
 0x5a9   : > { %v1992_v56 = vpop.eup %1991  ;;  %v1372_v57 = vadd.f32 1e-05, %v1370_v55 }
 0x5aa   : > { %v1374_v58 = vmul.f32 %v1992_v56, %v1371_v53  ;;  %vm1380_vm5 = vweird.f32 %v1992_v56 }
 0x5ab   : > { %1993 = vrsqrt.f32 %v1372_v57  ;;  %vm1381_vm7 = vmor %vm1379_vm6, %vm1380_vm5  ;;  %vm1389_vm9 = vweird.f32 %v1372_v57 }
 0x5ac   : > { %v1375_v46 = vmul.f32 %v1992_v56, %v1374_v58 }
 0x5ae   : > { %v1376_v59 = vmul.f32 0.5, %v1375_v46 }
 0x5b0   : > { %v1377_v40 = vsub.f32 1.5, %v1376_v59 }
 0x5b1   : > { %v1994_v60 = vpop.eup %1993 }
 0x5b2   : > { %v1378_v61 = vmul.f32 %v1992_v56, %v1377_v40  ;;  %v1384_v62 = vmul.f32 %v1994_v60, %v1372_v57  ;;  %vm1390_vm8 = vweird.f32 %v1994_v60 }
 0x5b3   : > { %vm1391_vm10 = vmor %vm1389_vm9, %vm1390_vm8 }
 0x5b4   : > { %v1382_v63 = vsel %vm1381_vm7, %v1992_v56, %v1378_v61  ;;  %v1385_v0 = vmul.f32 %v1994_v60, %v1384_v62 }
 0x5b5   : > { %v1393_v2 = vmul.f32 %v1382_v63, %v1361_v47 }
 0x5b6   : > { %v1386_v3 = vmul.f32 0.5, %v1385_v0 }
 0x5b7   : > { %v1399_v4 = vmul.f32 %v1955_v21, %v1393_v2 }
 0x5b8   : > { %v1387_v5 = vsub.f32 1.5, %v1386_v3 }
 0x5b9   : > { %v1405_v6 = vadd.f32 %v1956_v1, %v1399_v4 }
 0x5ba   : > { %v1388_v7 = vmul.f32 %v1994_v60, %v1387_v5 }
 0x5bb   : > { %1407 = vst [vmem:[%s559_s19] sm:$0xff] %v1405_v6 }
 0x5bc   : > { %v1392_v8 = vsel %vm1391_vm10, %v1994_v60, %v1388_v7 }
 0x5bd   : > { %v1394_v9 = vmul.f32 %v1392_v8, %v1362_v50 }
 0x5bf   : > { %v1400_v10 = vmul.f32 %v1955_v21, %v1394_v9 }
 0x5c1   : > { %v1406_v11 = vadd.f32 %v1956_v1, %v1400_v10 }
 0x5c3   : > { %1408 = vst [vmem:[%s559_s19 + $0x8] sm:$0xff] %v1406_v11 }
 0x5c4   : > { %2202 = shalt.err (!%p2199_p0)
}
 0x5c5   : > { %s2287_s17 = smov 128   ;;  %s2288_s21 = smov 8  }
 0x5c6   : > { %1793 = dma.vmem_to_hbm [thread:$0]  (%p2451_p7), %s1425_s14, 256, %s1427_s20, %s1410_s24, %s2287_s17, %s2287_s17, %s2288_s21  }
 0x5c7 PF: > { %s2691_s6 = sld [smem:[#allocation20_spill]]  ;;  %p1816_p3 = pnand %p1582_p11, %p2399_p6 }
 0x5c9   : > { %p1817_p5 = pneg %p1816_p3 }
 0x5cd   : > { %s1441_s23 = sand.u32 1, %s2691_s6  }
 0x5ce   : > { %s1442_s16 = scalar_lea.sflag [#allocation4], %s1441_s23 }
 0x5cf   : > { %2248 = dma.done.wait (%p1817_p5), %s1442_s16, 256  }
 0x5d0   : > { %2250 = vsyncadd (%p1817_p5), %s1442_s16, 4294967040  ;;  %s33_s26 = sadd.s32 1, %s2273_s26   ;;  %s2693_s30 = sld [smem:[#allocation21_spill]] }
 0x5d1   : > { %p30_p9 = scmp.ge.s32.totalorder %s33_s26, 4   ;;  %s2694_s23 = sld [smem:[#allocation25_spill]] }
 0x5d2   : > { %s2695_s24 = sld [smem:[#allocation22_spill]]  ;;  %s2697_s21 = smov %s2257_s22 }
 0x5d3   : > { %s2696_s25 = sld [smem:[#allocation24_spill]]  ;;  %32 = sbr.rel (!%p30_p9) target bundleno = 17 (0x11), region = 142 }
 0x5d6   : > { %s2698_s22 = smov %s2693_s30 }
 0x5d8   :  { %1448 = vsyncpa [#allocation3], 1 }
 0x5d9   :  { %1450 = vsyncpa [#allocation3 + $0x1], 1 }
 0x5da   :  { %1451 = vsyncpa [#allocation6], 1 }
 0x5db   :  { %1453 = vsyncpa [#allocation6 + $0x1], 1 }
 0x5dc   :  { %1454 = vsyncpa [#allocation9], 1 }
 0x5dd   :  { %1455 = vsyncpa [#allocation12], 1 }
 0x5de   :  { %1456 = vsyncpa [#allocation4], 1 }
 0x5df   :  { %1458 = vsyncpa [#allocation4 + $0x1], 1 }

</bundles_post_ra>
